<compile_context>
chip_gen: v6e
topology: v6e:2x2x1
jax: 0.10.0
libtpu: 0.0.40
codegen_flags: <defaults>
</compile_context>

<pallas_src>
import functools

import jax
import jax.numpy as jnp
from jax.experimental import pallas as pl
from jax.experimental.pallas import tpu as pltpu


def _fast_reciprocal(x):
    """EUP approx reciprocal + one Newton step (~full f32 accuracy)."""
    r = pl.reciprocal(x, approx=True)
    return r * (2.0 - x * r)


def distill_loss_kernel(temps_ref, student_ref, teacher_ref, out_ref, q_scr, *,
                        beta):
    # temps_ref:   SMEM (2,)          [1/student_temp, 1/teacher_temp]
    # student_ref: VMEM (1, TB, D)    logits of student crop v = program_id(1)
    # teacher_ref: VMEM (2, TB, D)    logits of both teacher chunks (resident across v)
    # out_ref:     VMEM (1, 8, 128)   lane-dense partial sum, resident across v
    # q_scr:       VMEM (2, TB, D) f32 scratch holding the teacher softmax q
    inv_student_temp = temps_ref[0]
    inv_teacher_temp = temps_ref[1]
    v = pl.program_id(1)

    def softmax_rows(raw, inv_temp):
        logits = raw.astype(jnp.float32) * inv_temp
        m = jnp.max(logits, axis=-1, keepdims=True)                 # XLU
        e = jnp.exp(logits - m)                                     # EUP
        # Lane-sum denominator + EUP approx reciprocal (Newton-refined on VALU).
        return e * _fast_reciprocal(jnp.sum(e, axis=-1, keepdims=True))

    # Crop axis is the innermost grid axis: compute the teacher softmax (both
    # chunks) once per row tile and zero the resident output accumulator.
    @pl.when(v == 0)
    def _():
        out_ref[...] = jnp.zeros_like(out_ref)
        for iq in range(2):
            q_scr[iq] = softmax_rows(teacher_ref[iq], inv_teacher_temp)

    sv = softmax_rows(student_ref[0], inv_student_temp)
    # TODO(synk): no eps clamp on sv / (1 - sv) -- matches the PyTorch
    # reference, which has the same saturation exposure for near-one-hot rows.
    inv_s = _fast_reciprocal(sv)           # 1 / s
    inv_1ms = _fast_reciprocal(1.0 - sv)   # 1 / (1 - s)

    for iq in range(2):
        @pl.when(v != iq)   # reference skips the v == iq pair; skip at runtime
        def _(iq=iq):
            q = q_scr[iq]
            t1 = jnp.sum(q * q * inv_s, axis=-1, keepdims=True)            # sum_d q^2 / s
            t2 = jnp.sum((1.0 - q) * (1.0 - q) * inv_1ms, axis=-1,
                         keepdims=True)                                     # sum_d (1-q)^2 / (1-s)
            contrib = jnp.sum(jnp.log(t1) + beta * jnp.log(t2))
            out_ref[...] += jnp.broadcast_to(contrib, out_ref.shape)


def _vmem_request_bytes():
    """Generation-aware VMEM request: physical capacity minus headroom for
    compiler-internal scratch (v7x: 64 -> 56 MiB, v5e/v6e: 128 -> 112 MiB)."""
    cap = 64 * 1024 * 1024
    try:
        info = pltpu.get_tpu_info()
        cap = int(getattr(info, "vmem_capacity_bytes", cap) or cap)
    except Exception:
        pass
    return max(32 * 1024 * 1024, cap - 8 * 1024 * 1024)


def _choose_row_tile(batch, d, in_bytes, budget_bytes):
    """Pick the row-tile size TB from the *real* per-grid-step working set:
      - double-buffered student (1,TB,D) and teacher (2,TB,D) input blocks,
      - the persistent teacher-q scratch (2,TB,D) f32,
      - ~6 (TB,D) f32 in-kernel temporaries (exp, sv, 1/s, 1/(1-s), products).
    Prefers TB <= batch/2 so the "parallel" row axis has >= 2 steps (v7x
    megacore), and raises instead of silently picking a tile that cannot fit.
    """
    bytes_per_row = d * (2 * (1 + 2) * in_bytes + (2 + 6) * 4)
    cap_rows = max(8, (budget_bytes // bytes_per_row) // 8 * 8)
    candidates = [t for t in range(8, batch + 1, 8) if batch % t == 0]
    if not candidates:
        candidates = [batch]   # full-extent block is exempt from the /8 rule
    feasible = [t for t in candidates if t <= cap_rows]
    if not feasible:
        raise ValueError(
            f"DistillLoss: no row tile of batch={batch} fits the VMEM budget "
            f"({budget_bytes} bytes) for D={d}; reduce D or the batch size.")
    half = [t for t in feasible if t * 2 <= batch]
    return max(half) if half else max(feasible)


class DistillLoss:
    """JAX/Pallas port of the PyTorch DistillLoss module (forward only)."""

    def __init__(self, warmup_teacher_temp_epochs, nepochs, ncrops=2,
                 warmup_teacher_temp=0.07, teacher_temp=0.04,
                 student_temp=0.1, beta=1.0):
        self.student_temp = float(student_temp)
        self.ncrops = int(ncrops)
        self.beta = float(beta)
        self.teacher_temp_schedule = jnp.concatenate((
            jnp.linspace(warmup_teacher_temp, teacher_temp,
                         warmup_teacher_temp_epochs),
            jnp.ones(nepochs - warmup_teacher_temp_epochs) * teacher_temp,
        )).astype(jnp.float32)

    def __call__(self, student_output, teacher_output, epoch):
        n_student, d = student_output.shape
        n_teacher, d2 = teacher_output.shape
        assert d == d2
        assert n_student % self.ncrops == 0 and n_teacher % 2 == 0
        batch = n_student // self.ncrops
        assert n_teacher // 2 == batch

        # Runtime teacher temperature -> no recompile across epochs.
        temp = self.teacher_temp_schedule[epoch]
        temps = jnp.stack([
            jnp.asarray(1.0 / self.student_temp, jnp.float32),
            (1.0 / temp).astype(jnp.float32),
        ])

        in_bytes = jnp.dtype(student_output.dtype).itemsize
        vmem_request = _vmem_request_bytes()
        tile_budget = max(2 * 1024 * 1024, vmem_request - 4 * 1024 * 1024)
        tb = _choose_row_tile(batch, d, in_bytes, tile_budget)
        num_tiles = batch // tb
        n_terms = 2 * self.ncrops - 2

        # Keep the caller's dtype (e.g. bf16): the kernel upcasts in VMEM, so
        # HBM traffic is halved vs pre-casting to f32 here.
        student = student_output.reshape(self.ncrops, batch, d)
        teacher = teacher_output.reshape(2, batch, d)

        kernel = functools.partial(distill_loss_kernel, beta=self.beta)

        partials = pl.pallas_call(
            kernel,
            out_shape=jax.ShapeDtypeStruct((num_tiles, 8, 128), jnp.float32),
            grid_spec=pltpu.PrefetchScalarGridSpec(
                num_scalar_prefetch=1,
                grid=(num_tiles, self.ncrops),
                in_specs=[
                    # Student: one crop per grid step along the crop axis.
                    pl.BlockSpec((1, tb, d),
                                 lambda r, v, temps_smem: (v, r, 0)),
                    # Teacher: resident across the crop axis (re-DMA'd only
                    # when the row tile changes).
                    pl.BlockSpec((2, tb, d),
                                 lambda r, v, temps_smem: (0, r, 0)),
                ],
                out_specs=pl.BlockSpec((1, 8, 128),
                                       lambda r, v, temps_smem: (r, 0, 0)),
                scratch_shapes=[pltpu.VMEM((2, tb, d), jnp.float32)],
            ),
            compiler_params=pltpu.CompilerParams(
                dimension_semantics=("parallel", "arbitrary"),
                vmem_limit_bytes=vmem_request,
            ),
        )(temps, student, teacher)

        return jnp.sum(partials[:, 0, 0]) / jnp.float32(n_terms * batch)


def _reference_loss(student_output, teacher_output, epoch, module):
    """Pure-JAX reference mirroring the PyTorch forward."""
    temp = module.teacher_temp_schedule[int(epoch)]
    s = jax.nn.softmax(student_output.astype(jnp.float32) / module.student_temp,
                       axis=-1)
    t = jax.nn.softmax(teacher_output.astype(jnp.float32) / temp, axis=-1)
    batch = student_output.shape[0] // module.ncrops
    s_chunks = [s[i * batch:(i + 1) * batch] for i in range(module.ncrops)]
    t_chunks = [t[i * batch:(i + 1) * batch] for i in range(2)]
    total, n = 0.0, 0
    for iq, q in enumerate(t_chunks):
        for v in range(len(s_chunks)):
            if v == iq:
                continue
            r1 = jnp.mean(jnp.log(jnp.sum(q ** 2 / s_chunks[v], axis=-1)))
            r2 = jnp.mean(jnp.log(jnp.sum((1 - q) ** 2 / (1 - s_chunks[v]),
                                          axis=-1)))
            total = total + r1 + module.beta * r2
            n += 1
    return total / n


if __name__ == "__main__":
    # Small deterministic example: ncrops=3, per-crop batch B=16, feature D=256
    # (grid = (2 row tiles, 3 crops) so the resident-teacher / accumulator and
    # the v != iq gating paths are all exercised).
    ncrops, B, D = 3, 16, 256
    key = jax.random.PRNGKey(0)
    k1, k2 = jax.random.split(key)
    # 0.3x logits keep the softmaxes away from exact f32 saturation (the
    # reference, like the PyTorch module, does not clamp s / 1-s).
    student_output = 0.3 * jax.random.normal(k1, (ncrops * B, D), dtype=jnp.float32)
    teacher_output = 0.3 * jax.random.normal(k2, (2 * B, D), dtype=jnp.float32)

    module = DistillLoss(warmup_teacher_temp_epochs=3, nepochs=10, ncrops=ncrops,
                         warmup_teacher_temp=0.07, teacher_temp=0.04,
                         student_temp=0.1, beta=1.0)

    epoch = 1
    loss = jax.block_until_ready(module(student_output, teacher_output, epoch))

    ref = jax.block_until_ready(
        _reference_loss(student_output, teacher_output, epoch, module))
    assert jnp.allclose(loss, ref, rtol=1e-4, atol=1e-4), (loss, ref)

    print("KERNEL_OK")
</pallas_src>

<mosaic_0001>
module attributes {stable_mosaic.version = 11 : i64} {
  func.func @distill_loss_kernel(%arg0: i32, %arg1: i32, %arg2: memref<2xf32, #tpu.memory_space<smem>>, %arg3: memref<1x8x256xf32, #tpu.memory_space<vmem>>, %arg4: memref<2x8x256xf32, #tpu.memory_space<vmem>>, %arg5: memref<1x8x128xf32, #tpu.memory_space<vmem>>, %arg6: memref<2x8x256xf32, #tpu.memory_space<vmem>>) attributes {dimension_semantics = [#tpu.dimension_semantics<parallel>, #tpu.dimension_semantics<arbitrary>], iteration_bounds = array<i64: 2, 3>, scalar_prefetch = 1 : i64, scratch_operands = 1 : i64, tpu.core_type = #tpu.core_type<tc>, window_params = [{transform_indices = @transform_0, window_bounds = array<i64: 1, 8, 256>}, {transform_indices = @transform_1, window_bounds = array<i64: 2, 8, 256>}, {transform_indices = @transform_2, window_bounds = array<i64: 1, 8, 128>}]} {
    %c0 = arith.constant 0 : index
    %0 = memref.load %arg2[%c0] : memref<2xf32, #tpu.memory_space<smem>>
    %c1 = arith.constant 1 : index
    %1 = memref.load %arg2[%c1] : memref<2xf32, #tpu.memory_space<smem>>
    %c0_i32 = arith.constant 0 : i32
    %2 = arith.cmpi eq, %arg1, %c0_i32 : i32
    %3 = arith.extui %2 : i1 to i32
    %c0_i32_0 = arith.constant 0 : i32
    %4 = arith.cmpi ne, %3, %c0_i32_0 : i32
    scf.if %4 {
      %cst_12 = arith.constant 0.000000e+00 : f32
      %41 = vector.broadcast %cst_12 : f32 to vector<1x8x128xf32>
      %c0_13 = arith.constant 0 : index
      %c0_14 = arith.constant 0 : index
      %c0_15 = arith.constant 0 : index
      %42 = vector.load %arg5[%c0_13, %c0_14, %c0_15] : memref<1x8x128xf32, #tpu.memory_space<vmem>>, vector<1x8x128xf32>
      tpu.vector_store %arg5[%c0_13, %c0_14, %c0_15], %41 {strides = array<i32>} : memref<1x8x128xf32, #tpu.memory_space<vmem>>, vector<1x8x128xf32>,
      %c0_16 = arith.constant 0 : index
      %c0_17 = arith.constant 0 : index
      %c0_18 = arith.constant 0 : index
      %43 = vector.load %arg4[%c0_16, %c0_17, %c0_18] : memref<2x8x256xf32, #tpu.memory_space<vmem>>, vector<1x8x256xf32>
      %44 = vector.shape_cast %43 : vector<1x8x256xf32> to vector<8x256xf32>
      %45 = vector.broadcast %1 : f32 to vector<8x256xf32>
      %46 = arith.mulf %44, %45 : vector<8x256xf32>
      %cst_19 = arith.constant dense<0xFF800000> : vector<8xf32>
      %47 = vector.multi_reduction <maximumf>, %46, %cst_19 [1] : vector<8x256xf32> to vector<8xf32>
      %48 = vector.shape_cast %47 : vector<8xf32> to vector<8x1xf32>
      %49 = vector.broadcast %48 : vector<8x1xf32> to vector<8x256xf32>
      %50 = arith.subf %46, %49 : vector<8x256xf32>
      %51 = math.exp %50 : vector<8x256xf32>
      %cst_20 = arith.constant dense<0.000000e+00> : vector<8xf32>
      %52 = vector.multi_reduction <add>, %51, %cst_20 [1] : vector<8x256xf32> to vector<8xf32>
      %53 = vector.shape_cast %52 : vector<8xf32> to vector<8x1xf32>
      %54 = tpu.reciprocal %53 {approx = true} : vector<8x1xf32> -> vector<8x1xf32>
      %55 = arith.mulf %53, %54 : vector<8x1xf32>
      %cst_21 = arith.constant 2.000000e+00 : f32
      %56 = vector.broadcast %cst_21 : f32 to vector<8x1xf32>
      %57 = arith.subf %56, %55 : vector<8x1xf32>
      %58 = arith.mulf %54, %57 : vector<8x1xf32>
      %59 = vector.broadcast %58 : vector<8x1xf32> to vector<8x256xf32>
      %60 = arith.mulf %51, %59 : vector<8x256xf32>
      %c0_22 = arith.constant 0 : index
      %c0_23 = arith.constant 0 : index
      %c0_24 = arith.constant 0 : index
      %61 = vector.load %arg6[%c0_22, %c0_23, %c0_24] : memref<2x8x256xf32, #tpu.memory_space<vmem>>, vector<1x8x256xf32>
      %62 = vector.shape_cast %61 : vector<1x8x256xf32> to vector<8x256xf32>
      %63 = vector.shape_cast %60 : vector<8x256xf32> to vector<1x8x256xf32>
      tpu.vector_store %arg6[%c0_22, %c0_23, %c0_24], %63 {strides = array<i32>} : memref<2x8x256xf32, #tpu.memory_space<vmem>>, vector<1x8x256xf32>,
      %c1_25 = arith.constant 1 : index
      %c0_26 = arith.constant 0 : index
      %c0_27 = arith.constant 0 : index
      %64 = vector.load %arg4[%c1_25, %c0_26, %c0_27] : memref<2x8x256xf32, #tpu.memory_space<vmem>>, vector<1x8x256xf32>
      %65 = vector.shape_cast %64 : vector<1x8x256xf32> to vector<8x256xf32>
      %66 = vector.broadcast %1 : f32 to vector<8x256xf32>
      %67 = arith.mulf %65, %66 : vector<8x256xf32>
      %cst_28 = arith.constant dense<0xFF800000> : vector<8xf32>
      %68 = vector.multi_reduction <maximumf>, %67, %cst_28 [1] : vector<8x256xf32> to vector<8xf32>
      %69 = vector.shape_cast %68 : vector<8xf32> to vector<8x1xf32>
      %70 = vector.broadcast %69 : vector<8x1xf32> to vector<8x256xf32>
      %71 = arith.subf %67, %70 : vector<8x256xf32>
      %72 = math.exp %71 : vector<8x256xf32>
      %cst_29 = arith.constant dense<0.000000e+00> : vector<8xf32>
      %73 = vector.multi_reduction <add>, %72, %cst_29 [1] : vector<8x256xf32> to vector<8xf32>
      %74 = vector.shape_cast %73 : vector<8xf32> to vector<8x1xf32>
      %75 = tpu.reciprocal %74 {approx = true} : vector<8x1xf32> -> vector<8x1xf32>
      %76 = arith.mulf %74, %75 : vector<8x1xf32>
      %cst_30 = arith.constant 2.000000e+00 : f32
      %77 = vector.broadcast %cst_30 : f32 to vector<8x1xf32>
      %78 = arith.subf %77, %76 : vector<8x1xf32>
      %79 = arith.mulf %75, %78 : vector<8x1xf32>
      %80 = vector.broadcast %79 : vector<8x1xf32> to vector<8x256xf32>
      %81 = arith.mulf %72, %80 : vector<8x256xf32>
      %c1_31 = arith.constant 1 : index
      %c0_32 = arith.constant 0 : index
      %c0_33 = arith.constant 0 : index
      %82 = vector.load %arg6[%c1_31, %c0_32, %c0_33] : memref<2x8x256xf32, #tpu.memory_space<vmem>>, vector<1x8x256xf32>
      %83 = vector.shape_cast %82 : vector<1x8x256xf32> to vector<8x256xf32>
      %84 = vector.shape_cast %81 : vector<8x256xf32> to vector<1x8x256xf32>
      tpu.vector_store %arg6[%c1_31, %c0_32, %c0_33], %84 {strides = array<i32>} : memref<2x8x256xf32, #tpu.memory_space<vmem>>, vector<1x8x256xf32>,
    } else {
    }
    %c0_1 = arith.constant 0 : index
    %c0_2 = arith.constant 0 : index
    %c0_3 = arith.constant 0 : index
    %5 = vector.load %arg3[%c0_1, %c0_2, %c0_3] : memref<1x8x256xf32, #tpu.memory_space<vmem>>, vector<1x8x256xf32>
    %6 = vector.shape_cast %5 : vector<1x8x256xf32> to vector<8x256xf32>
    %7 = vector.broadcast %0 : f32 to vector<8x256xf32>
    %8 = arith.mulf %6, %7 : vector<8x256xf32>
    %cst = arith.constant dense<0xFF800000> : vector<8xf32>
    %9 = vector.multi_reduction <maximumf>, %8, %cst [1] : vector<8x256xf32> to vector<8xf32>
    %10 = vector.shape_cast %9 : vector<8xf32> to vector<8x1xf32>
    %11 = vector.broadcast %10 : vector<8x1xf32> to vector<8x256xf32>
    %12 = arith.subf %8, %11 : vector<8x256xf32>
    %13 = math.exp %12 : vector<8x256xf32>
    %cst_4 = arith.constant dense<0.000000e+00> : vector<8xf32>
    %14 = vector.multi_reduction <add>, %13, %cst_4 [1] : vector<8x256xf32> to vector<8xf32>
    %15 = vector.shape_cast %14 : vector<8xf32> to vector<8x1xf32>
    %16 = tpu.reciprocal %15 {approx = true} : vector<8x1xf32> -> vector<8x1xf32>
    %17 = arith.mulf %15, %16 : vector<8x1xf32>
    %cst_5 = arith.constant 2.000000e+00 : f32
    %18 = vector.broadcast %cst_5 : f32 to vector<8x1xf32>
    %19 = arith.subf %18, %17 : vector<8x1xf32>
    %20 = arith.mulf %16, %19 : vector<8x1xf32>
    %21 = vector.broadcast %20 : vector<8x1xf32> to vector<8x256xf32>
    %22 = arith.mulf %13, %21 : vector<8x256xf32>
    %23 = tpu.reciprocal %22 {approx = true} : vector<8x256xf32> -> vector<8x256xf32>
    %24 = arith.mulf %22, %23 : vector<8x256xf32>
    %cst_6 = arith.constant 2.000000e+00 : f32
    %25 = vector.broadcast %cst_6 : f32 to vector<8x256xf32>
    %26 = arith.subf %25, %24 : vector<8x256xf32>
    %27 = arith.mulf %23, %26 : vector<8x256xf32>
    %cst_7 = arith.constant 1.000000e+00 : f32
    %28 = vector.broadcast %cst_7 : f32 to vector<8x256xf32>
    %29 = arith.subf %28, %22 : vector<8x256xf32>
    %30 = tpu.reciprocal %29 {approx = true} : vector<8x256xf32> -> vector<8x256xf32>
    %31 = arith.mulf %29, %30 : vector<8x256xf32>
    %cst_8 = arith.constant 2.000000e+00 : f32
    %32 = vector.broadcast %cst_8 : f32 to vector<8x256xf32>
    %33 = arith.subf %32, %31 : vector<8x256xf32>
    %34 = arith.mulf %30, %33 : vector<8x256xf32>
    %c0_i32_9 = arith.constant 0 : i32
    %35 = arith.cmpi ne, %arg1, %c0_i32_9 : i32
    %36 = arith.extui %35 : i1 to i32
    %c0_i32_10 = arith.constant 0 : i32
    %37 = arith.cmpi ne, %36, %c0_i32_10 : i32
    scf.if %37 {
      %c0_12 = arith.constant 0 : index
      %c0_13 = arith.constant 0 : index
      %c0_14 = arith.constant 0 : index
      %41 = vector.load %arg6[%c0_12, %c0_13, %c0_14] : memref<2x8x256xf32, #tpu.memory_space<vmem>>, vector<1x8x256xf32>
      %42 = vector.shape_cast %41 : vector<1x8x256xf32> to vector<8x256xf32>
      %43 = arith.mulf %42, %42 : vector<8x256xf32>
      %44 = arith.mulf %43, %27 : vector<8x256xf32>
      %cst_15 = arith.constant dense<0.000000e+00> : vector<8xf32>
      %45 = vector.multi_reduction <add>, %44, %cst_15 [1] : vector<8x256xf32> to vector<8xf32>
      %46 = vector.shape_cast %45 : vector<8xf32> to vector<8x1xf32>
      %cst_16 = arith.constant 1.000000e+00 : f32
      %47 = vector.broadcast %cst_16 : f32 to vector<8x256xf32>
      %48 = arith.subf %47, %42 : vector<8x256xf32>
      %cst_17 = arith.constant 1.000000e+00 : f32
      %49 = vector.broadcast %cst_17 : f32 to vector<8x256xf32>
      %50 = arith.subf %49, %42 : vector<8x256xf32>
      %51 = arith.mulf %48, %50 : vector<8x256xf32>
      %52 = arith.mulf %51, %34 : vector<8x256xf32>
      %cst_18 = arith.constant dense<0.000000e+00> : vector<8xf32>
      %53 = vector.multi_reduction <add>, %52, %cst_18 [1] : vector<8x256xf32> to vector<8xf32>
      %54 = vector.shape_cast %53 : vector<8xf32> to vector<8x1xf32>
      %55 = math.log %46 : vector<8x1xf32>
      %56 = math.log %54 : vector<8x1xf32>
      %cst_19 = arith.constant 1.000000e+00 : f32
      %57 = vector.broadcast %cst_19 : f32 to vector<8x1xf32>
      %58 = arith.mulf %57, %56 : vector<8x1xf32>
      %59 = arith.addf %55, %58 : vector<8x1xf32>
      %60 = vector.shape_cast %59 : vector<8x1xf32> to vector<1x8x1xf32>
      %cst_20 = arith.constant dense<0.000000e+00> : vector<1xf32>
      %61 = vector.multi_reduction <add>, %60, %cst_20 [1, 2] : vector<1x8x1xf32> to vector<1xf32>
      %62 = vector.shape_cast %61 : vector<1xf32> to vector<1x1x1xf32>
      %63 = vector.extract %62[0, 0, 0] : f32 from vector<1x1x1xf32>
      %c0_21 = arith.constant 0 : index
      %c0_22 = arith.constant 0 : index
      %c0_23 = arith.constant 0 : index
      %64 = vector.load %arg5[%c0_21, %c0_22, %c0_23] : memref<1x8x128xf32, #tpu.memory_space<vmem>>, vector<1x8x128xf32>
      %65 = vector.broadcast %63 : f32 to vector<1x8x128xf32>
      %66 = arith.addf %64, %65 : vector<1x8x128xf32>
      %c0_24 = arith.constant 0 : index
      %c0_25 = arith.constant 0 : index
      %c0_26 = arith.constant 0 : index
      %67 = vector.load %arg5[%c0_24, %c0_25, %c0_26] : memref<1x8x128xf32, #tpu.memory_space<vmem>>, vector<1x8x128xf32>
      tpu.vector_store %arg5[%c0_24, %c0_25, %c0_26], %66 {strides = array<i32>} : memref<1x8x128xf32, #tpu.memory_space<vmem>>, vector<1x8x128xf32>,
    } else {
    }
    %c1_i32 = arith.constant 1 : i32
    %38 = arith.cmpi ne, %arg1, %c1_i32 : i32
    %39 = arith.extui %38 : i1 to i32
    %c0_i32_11 = arith.constant 0 : i32
    %40 = arith.cmpi ne, %39, %c0_i32_11 : i32
    scf.if %40 {
      %c1_12 = arith.constant 1 : index
      %c0_13 = arith.constant 0 : index
      %c0_14 = arith.constant 0 : index
      %41 = vector.load %arg6[%c1_12, %c0_13, %c0_14] : memref<2x8x256xf32, #tpu.memory_space<vmem>>, vector<1x8x256xf32>
      %42 = vector.shape_cast %41 : vector<1x8x256xf32> to vector<8x256xf32>
      %43 = arith.mulf %42, %42 : vector<8x256xf32>
      %44 = arith.mulf %43, %27 : vector<8x256xf32>
      %cst_15 = arith.constant dense<0.000000e+00> : vector<8xf32>
      %45 = vector.multi_reduction <add>, %44, %cst_15 [1] : vector<8x256xf32> to vector<8xf32>
      %46 = vector.shape_cast %45 : vector<8xf32> to vector<8x1xf32>
      %cst_16 = arith.constant 1.000000e+00 : f32
      %47 = vector.broadcast %cst_16 : f32 to vector<8x256xf32>
      %48 = arith.subf %47, %42 : vector<8x256xf32>
      %cst_17 = arith.constant 1.000000e+00 : f32
      %49 = vector.broadcast %cst_17 : f32 to vector<8x256xf32>
      %50 = arith.subf %49, %42 : vector<8x256xf32>
      %51 = arith.mulf %48, %50 : vector<8x256xf32>
      %52 = arith.mulf %51, %34 : vector<8x256xf32>
      %cst_18 = arith.constant dense<0.000000e+00> : vector<8xf32>
      %53 = vector.multi_reduction <add>, %52, %cst_18 [1] : vector<8x256xf32> to vector<8xf32>
      %54 = vector.shape_cast %53 : vector<8xf32> to vector<8x1xf32>
      %55 = math.log %46 : vector<8x1xf32>
      %56 = math.log %54 : vector<8x1xf32>
      %cst_19 = arith.constant 1.000000e+00 : f32
      %57 = vector.broadcast %cst_19 : f32 to vector<8x1xf32>
      %58 = arith.mulf %57, %56 : vector<8x1xf32>
      %59 = arith.addf %55, %58 : vector<8x1xf32>
      %60 = vector.shape_cast %59 : vector<8x1xf32> to vector<1x8x1xf32>
      %cst_20 = arith.constant dense<0.000000e+00> : vector<1xf32>
      %61 = vector.multi_reduction <add>, %60, %cst_20 [1, 2] : vector<1x8x1xf32> to vector<1xf32>
      %62 = vector.shape_cast %61 : vector<1xf32> to vector<1x1x1xf32>
      %63 = vector.extract %62[0, 0, 0] : f32 from vector<1x1x1xf32>
      %c0_21 = arith.constant 0 : index
      %c0_22 = arith.constant 0 : index
      %c0_23 = arith.constant 0 : index
      %64 = vector.load %arg5[%c0_21, %c0_22, %c0_23] : memref<1x8x128xf32, #tpu.memory_space<vmem>>, vector<1x8x128xf32>
      %65 = vector.broadcast %63 : f32 to vector<1x8x128xf32>
      %66 = arith.addf %64, %65 : vector<1x8x128xf32>
      %c0_24 = arith.constant 0 : index
      %c0_25 = arith.constant 0 : index
      %c0_26 = arith.constant 0 : index
      %67 = vector.load %arg5[%c0_24, %c0_25, %c0_26] : memref<1x8x128xf32, #tpu.memory_space<vmem>>, vector<1x8x128xf32>
      tpu.vector_store %arg5[%c0_24, %c0_25, %c0_26], %66 {strides = array<i32>} : memref<1x8x128xf32, #tpu.memory_space<vmem>>, vector<1x8x128xf32>,
    } else {
    }
    return
  }
  func.func @transform_0(%arg0: i32, %arg1: i32, %arg2: memref<2xf32, #tpu.memory_space<smem>>) -> (i32, i32, i32) {
    %c0_i32 = arith.constant 0 : i32
    %c0_i32_0 = arith.constant 0 : i32
    return %arg1, %arg0, %c0_i32 : i32, i32, i32
  }
  func.func @transform_1(%arg0: i32, %arg1: i32, %arg2: memref<2xf32, #tpu.memory_space<smem>>) -> (i32, i32, i32) {
    %c0_i32 = arith.constant 0 : i32
    %c0_i32_0 = arith.constant 0 : i32
    %c0_i32_1 = arith.constant 0 : i32
    return %c0_i32, %arg0, %c0_i32_0 : i32, i32, i32
  }
  func.func @transform_2(%arg0: i32, %arg1: i32, %arg2: memref<2xf32, #tpu.memory_space<smem>>) -> (i32, i32, i32) {
    %c0_i32 = arith.constant 0 : i32
    %c0_i32_0 = arith.constant 0 : i32
    %c0_i32_1 = arith.constant 0 : i32
    return %arg0, %c0_i32, %c0_i32_0 : i32, i32, i32
  }
}

</mosaic_0001>

<bundles_post_ra>
// kernel: tpu_custom_call.1
= control target key start
LH: loop header
LB: loop body
LE: loop exit
PB: predicated region body
PF: predicated region fallthrough
CT: control target
= control target key end

     0   :  { %s894_s12 = smov [#allocation4]   ;;  %s1179_s0 = inlined_call_operand.hbm [shape: f32[2], index: 0, kind: input, shape index: {}]   ;;  %s1180_s1 = inlined_call_operand.hbm [shape: f32[3,16,256], index: 1, kind: input, shape index: {}]   ;;  %s1181_s2 = inlined_call_operand.hbm [shape: f32[2,16,256], index: 2, kind: input, shape index: {}]   ;;  %s1182_s3 = inlined_call_operand.hbm [shape: f32[2,8,128], index: 3, kind: output, shape index: {}]  }
   0x1   :  { %9 = dma.hbm_to_smem %s1179_s0, 16, %s894_s12, [#allocation3] }
   0x2   :  { %836 = dma.done.wait [#allocation3], 16 }
   0x3   :  { %837 = vsyncadd [#allocation3], 4294967280 }
   0x4   :  { %11 = sfence }
   0x5   :  { %12 = vsyncpa [#allocation6], 0 }
   0x6   :  { %14 = vsyncpa [#allocation6 + $0x1], 0 }
   0x7   :  { %15 = vsyncpa [#allocation9], 0 }
   0x8   :  { %17 = vsyncpa [#allocation9 + $0x1], 0 }
   0x9   :  { %18 = vsyncpa [#allocation7], 0 }
   0xa   :  { %20 = vsyncpa [#allocation7 + $0x1], 0  ;;  %s925_s15 = smov 0   ;;  %s927_s16 = smov 0  }
   0xb   :  { %s929_s17 = smov 0   ;;  %s931_s18 = smov 0  }
   0xc   :  { %s933_s19 = smov 0   ;;  %s935_s0 = smov 0  }
   0xd   :  { %s937_s20 = smov 0   ;;  %s939_s21 = smov 0  }
   0xe   :  { %s941_s22 = smov 0   ;;  %s943_s23 = smov 0  }
   0xf   :  { %s945_s24 = smov 0  }
  0x10 LB: > { %1188 = sst [smem:[#allocation15_spill]] %s884_s22  ;;  %s526_s25 = sadd.s32 4294967295, %s892_s24   ;;  %s892_s24 = sphi %s945_s24, %s26_s24   ;;  %s888_s23 = sphi %s943_s23, %s1219_s23   ;;  %s884_s22 = sphi %s941_s22, %s1209_s22   ;;  %s880_s21 = sphi %s939_s21, %s1218_s21   ;;  %s876_s20 = sphi %s937_s20, %s1217_s20   ;;  %s872_s0 = sphi %s935_s0, %s1216_s0   ;;  %s868_s19 = sphi %s933_s19, %s1215_s19   ;;  %s864_s18 = sphi %s931_s18, %s1214_s18   ;;  %s860_s17 = sphi %s929_s17, %s1213_s17   ;;  %s856_s16 = sphi %s927_s16, %s1212_s16   ;;  %s852_s15 = sphi %s925_s15, %s1211_s15  }
  0x11   : > { %s527_s26 = sadd.s32 4294967294, %s892_s24   ;;  %s35_s27 = sadd.s32 1, %s884_s22 }
  0x12   : > { %s38_s28 = sadd.s32 1, %s888_s23  ;;  %p36_p0 = scmp.ge.s32.totalorder %s35_s27, 3 }
  0x13   : > { %s47_s29 = sadd.s32 1, %s872_s0  ;;  %p54_p1 = scmp.ne.s32.totalorder %s872_s0, %s868_s19 }
  0x14   : > { %p55_p2 = scmp.eq.s32.totalorder %s892_s24, 0  ;;  %s1221_s27 = smov (%p36_p0, %s35_s27), 0 }
  0x15   : > { %1189 = sst [smem:[#allocation16_spill]] %s1221_s27  ;;  %s1223_s28 = smov (!%p36_p0, %s38_s28), %s888_s23 }
  0x16   : > { %s42_s30 = ssub.s32 %s884_s22, %s1221_s27  ;;  %p993_p3 = por %p55_p2, %p54_p1 }
  0x17   : > { %p40_p4 = scmp.ge.s32.totalorder %s1223_s28, 2  ;;  %p60_p5 = scmp.ne.s32.totalorder %s868_s19, %s864_s18 }
  0x18   : > { %p998_p6 = scmp.eq.s32.totalorder %s526_s25, 0  ;;  %s73_s6 = sadd.s32 1, %s860_s17 }
  0x19   : > { %s1225_s28 = smov (%p40_p4, %s1223_s28), 0  ;;  %p80_p8 = scmp.ne.s32.totalorder %s860_s17, %s856_s16 }
  0x1a   : > { %1192 = sst [smem:[#allocation17_spill]] %s1225_s28  ;;  %p1007_p7 = por %p998_p6, %p60_p5 }
  0x1b   : > { %s43_s8 = ssub.s32 %s888_s23, %s1225_s28  ;;  %p86_p9 = scmp.ne.s32.totalorder %s856_s16, %s852_s15 }
  0x1c   : > { %s44_s9 = sor.u32 %s43_s8, %s42_s30  ;;  %p71_p10 = scmp.eq.s32.totalorder %s43_s8, 0 }
  0x1d   : > { %p45_p11 = scmp.eq.s32.totalorder %s44_s9, 0  ;;  %p1019_p12 = por %p80_p8, %p55_p2 }
  0x1e   : > { %s1024_s11 = scalar_select %p71_p10, %s860_s17, %s73_s6  }
  0x1f   : > { %s1027_s12 = scalar_select %p45_p11, %s872_s0, %s47_s29  }
  0x20   : > { %1195 = sst [smem:[#allocation18_spill]] %s1024_s11  ;;  %p1031_p13 = por %p86_p9, %p998_p6 }
  0x21   : > { %1196 = sst [smem:[#allocation19_spill]] %s1027_s12  ;;  %p110_p0 = scmp.eq.s32.totalorder %s526_s25, 5 }
  0x22   : > { %s1197_s13 = scalar_select %p1031_p13, 1, 0 }
  0x23   : > { %p116_p1 = scmp.eq.s32.totalorder %s527_s26, 5  ;;  %p1035_p2 = por %p110_p0, %p80_p8 }
  0x24   : > { %p573_p4 = scmp.lt.s32.totalorder %s892_s24, 6  ;;  %s136_s29 = sand.u32 1, %s872_s0  }
  0x25   : > { %s1198_s14 = scalar_select %p1035_p2, 1, 0 }
  0x26   : > { %p1040_p5 = por %p116_p1, %p86_p9  ;;  %s530_s30 = sshll.u32 %s136_s29, 4 }
  0x27   : > { %s531_s5 = sshll.u32 %s888_s23, 1  ;;  %s532_s6 = sshll.u32 %s884_s22, 2 }
  0x28   : > { %s1199_s18 = scalar_select %p1040_p5, 1, 0 }
  0x29   : > { %s140_s8 = scalar_lea.vmem [#allocation5], %s530_s30  ;;  %s146_s25 = sadd.s32 %s532_s6, %s531_s5 }
  0x2a   : > { %s150_s9 = sshll.u32 %s140_s8, 4  ;;  %s533_s28 = sshll.u32 %s146_s25, 7  ;;  %s151_s9 = int_to_ptr.vmem [resolvable:$true] %s150_s9 }
  0x2b   : > { %p1051_p6 = pnand %p573_p4, %p993_p3  ;;  %s148_s11 = scalar_lea.hbm %s1180_s1, %s533_s28 }
  0x2c   : > { %p1062_p8 = pnand %p573_p4, %p1019_p12  ;;  %p537_p9 = scmp.ge.s32.totalorder %s892_s24, 1 }
  0x2d   : > { %s137_s30 = scalar_lea.sflag [#allocation6], %s136_s29  ;;  %p712_p10 = pneg %p1051_p6 }
  0x2e   : > { %s723_s4 = scalar_lea.vmem %s151_s9, 256  ;;  %s895_s5 = smov [#allocation5]  }
  0x2f   : > { %p724_p3 = scmp.ne.s32.totalorder %s151_s9, %s723_s4  ;;  %s728_s6 = sshll.u32 %s895_s5, 4  ;;  %s729_s6 = int_to_ptr.vmem [resolvable:$false] %s728_s6 }
  0x30   : > { %s730_s27 = scalar_lea.vmem %s729_s6, 512  ;;  %p731_p1 = scmp.lt.s32.totalorder %s151_s9, %s729_s6 }
  0x31   : > { %p726_p11 = pnand %p724_p3, %p712_p10  ;;  %p732_p5 = scmp.lt.s32.totalorder %s730_s27, %s723_s4 }
  0x33   : > { %p727_p0 = pneg %p726_p11  ;;  %p733_p2 = por %p732_p5, %p731_p1 }
  0x35   : > { %p734_p13 = pnand %p733_p2, %p727_p0 }
  0x37   : > { %737 = shalt.err (!%p734_p13)
}
  0x38   : > { %565 = dma.hbm_to_vmem [thread:$0]  (!%p1051_p6), %s148_s11, 256, %s151_s9, %s137_s30  }
  0x39   : > { %p176_p12 = scmp.lt.s32.totalorder %s892_s24, 7  ;;  %s157_s28 = sand.u32 1, %s860_s17  }
  0x3a   : > { %s551_s10 = sshll.u32 %s888_s23, 8  ;;  %s534_s29 = sshll.u32 %s157_s28, 5 }
  0x3b   : > { %p1076_p4 = pnand %p537_p9, %p176_p12  ;;  %s167_s4 = scalar_lea.hbm %s1181_s2, %s551_s10 }
  0x3c   : > { %s161_s26 = scalar_lea.vmem [#allocation8], %s534_s29  ;;  %s158_s6 = scalar_lea.sflag [#allocation9], %s157_s28 }
  0x3d   : > { %s168_s5 = sshll.u32 %s161_s26, 4  ;;  %p740_p13 = pneg %p1062_p8  ;;  %s169_s5 = int_to_ptr.vmem [resolvable:$true] %s168_s5 }
  0x3e   : > { %s751_s11 = scalar_lea.vmem %s169_s5, 512  ;;  %s896_s9 = smov [#allocation8]  }
  0x3f   : > { %p752_p2 = scmp.ne.s32.totalorder %s169_s5, %s751_s11  ;;  %s756_s30 = sshll.u32 %s896_s9, 4  ;;  %s757_s30 = int_to_ptr.vmem [resolvable:$false] %s756_s30 }
  0x40   : > { %s758_s27 = scalar_lea.vmem %s757_s30, 1024  ;;  %p759_p9 = scmp.lt.s32.totalorder %s169_s5, %s757_s30 }
  0x41   : > { %p754_p5 = pnand %p752_p2, %p740_p13  ;;  %p760_p10 = scmp.lt.s32.totalorder %s758_s27, %s751_s11 }
  0x43   : > { %p755_p6 = pneg %p754_p5  ;;  %p761_p3 = por %p760_p10, %p759_p9 }
  0x45   : > { %p762_p11 = pnand %p761_p3, %p755_p6 }
  0x47   : > { %765 = shalt.err (!%p762_p11)
}
  0x48   : > { %s897_s10 = smov 512   ;;  %s898_s29 = smov 256  }
  0x49   : > { %s899_s8 = smov 16   ;;  %180 = sbr.rel (%p1076_p4) target bundleno = 1542 (0x606), region = 28 }
  0x4a   : > { %568 = dma.hbm_to_vmem [thread:$0]  (!%p1062_p8), %s167_s4, 512, %s169_s5, %s158_s6, %s897_s10, %s898_s29, %s899_s8  }
  0x4b   : > { %s182_s28 = sand.u32 (!%p1076_p4), 1, %s868_s19  }
  0x4c   : > { %s1090_s25 = sshll.u32 (!%p1076_p4), %s182_s28, 4  ;;  %s183_s26 = scalar_lea.sflag (!%p1076_p4), [#allocation6], %s182_s28 }
  0x4d   : > { %s186_s11 = scalar_lea.vmem (!%p1076_p4), [#allocation5], %s1090_s25 }
  0x4e   : > { %839 = dma.done.wait (%p1007_p7), %s183_s26, 256  }
  0x4f   : > { %841 = vsyncadd (%p1007_p7), %s183_s26, 4294967040  ;;  %s1098_s22 = sand.u32 1, %s856_s16   ;;  %p1203_p8 = scmp.ne.s32.totalorder %s1197_s13, 0 }
  0x50   : > { %s539_s12 = sshll.u32 %s1098_s22, 5  ;;  %s192_s4 = scalar_lea.sflag [#allocation9], %s1098_s22 }
  0x51   : > { %s195_s5 = scalar_lea.vmem [#allocation8], %s539_s12 }
  0x52   : > { %843 = dma.done.wait (%p1203_p8), %s192_s4, 512  }
  0x53   : > { %845 = vsyncadd (%p1203_p8), %s192_s4, 4294966784  ;;  %s540_s6 = sshll.u32 %s1098_s22, 3  ;;  %s1107_s9 = sld [smem:[#allocation4]] }
  0x54   : > { %s541_s7 = sld [smem:[#allocation4 + $0x1]]  ;;  %s1109_s30 = scalar_lea.vmem [#allocation10], %s540_s6 }
  0x55   : > { %p542_p7 = scmp.ne.s32.totalorder %s876_s20, 0 }
  0x57   : > { %226 = sbr.rel (%p542_p7) target bundleno = 421 (0x1a5), region = 40 }
  0x5c   : > { %v228_v0 = vld [vmem:[%s195_s5] sm:$0xff]  ;;  %v229_v1 = vld [vmem:[%s195_s5 + $0x8] sm:$0xff]  ;;  %v230_v2 = vstv %s541_s7  ;;  %v543_v3 = vld [vmem:[%s195_s5 + $0x10] sm:$0xff]  ;;  %v900_v27 = vmov 0.0  }
  0x5d   : > { %v231_v4 = vmul.f32 %v230_v2, %v228_v0  ;;  %v232_v5 = vmul.f32 %v230_v2, %v229_v1  ;;  %v544_v6 = vld [vmem:[%s195_s5 + $0x18] sm:$0xff]  ;;  %v256_v7 = vmul.f32 %v543_v3, %v230_v2  ;;  %227 = vst [vmem:[%s1109_s30] sm:$0xff] %v900_v27 }
  0x5e   : > { %v257_v8 = vmul.f32 %v544_v6, %v230_v2 }
  0x5f   : > { %v233_v9 = vmax.f32 %v231_v4, %v232_v5 }
  0x60   : > { %v258_v10 = vmax.f32 %v256_v7, %v257_v8 }
  0x61   : > { %234 = vmax.xlane.f32.xlu0 %v233_v9 }
  0x65   : > { %259 = vmax.xlane.f32.xlu0 %v258_v10 }
  0xea   : > { %v235_v11 = vpop.xlane.xlu0 %234 }
  0xeb   : > { %v236_v12 = vsub.f32 %v231_v4, %v235_v11  ;;  %v237_v13 = vsub.f32 %v232_v5, %v235_v11 }
  0xed   : > { %v238_v14 = vmul.f32 1.442695, %v236_v12  ;;  %v240_v15 = vmul.f32 1.442695, %v237_v13 }
  0xee   : > { %v260_v16 = vpop.xlane.xlu0 %259 }
  0xef   : > { %668 = vpow2.f32 %v238_v14  ;;  %v261_v17 = vsub.f32 %v256_v7, %v260_v16  ;;  %v262_v18 = vsub.f32 %v257_v8, %v260_v16 }
  0xf0   : > { %670 = vpow2.f32 %v240_v15 }
  0xf1   : > { %v263_v19 = vmul.f32 1.442695, %v261_v17  ;;  %v265_v20 = vmul.f32 1.442695, %v262_v18 }
  0xf3   : > { %672 = vpow2.f32 %v263_v19 }
  0xf4   : > { %674 = vpow2.f32 %v265_v20 }
  0xfc   : > { %v669_v21 = vpop.eup %668 }
  0xfd   : > { %v671_v22 = vpop.eup %670 }
  0xfe   : > { %v242_v23 = vadd.f32 %v671_v22, %v669_v21 }
 0x100   : > { %v673_v24 = vpop.eup %672  ;;  %243 = vadd.xlane.f32.xlu1 %v242_v23 }
 0x101   : > { %v675_v25 = vpop.eup %674 }
 0x102   : > { %v267_v26 = vadd.f32 %v675_v25, %v673_v24 }
 0x104   : > { %268 = vadd.xlane.f32.xlu1 %v267_v26 }
 0x189   : > { %v244_v28 = vpop.xlane.xlu1 %243 }
 0x18a   : > { %676 = vrcp.f32 %v244_v28 }
 0x18d   : > { %v269_v29 = vpop.xlane.xlu1 %268 }
 0x18e   : > { %678 = vrcp.f32 %v269_v29 }
 0x197   : > { %v677_v30 = vpop.eup %676 }
 0x198   : > { %v246_v31 = vmul.f32 %v677_v30, %v244_v28 }
 0x19a   : > { %v247_v32 = vsub.f32 2.0, %v246_v31 }
 0x19b   : > { %v679_v33 = vpop.eup %678 }
 0x19c   : > { %v248_v34 = vmul.f32 %v677_v30, %v247_v32  ;;  %v271_v35 = vmul.f32 %v679_v33, %v269_v29 }
 0x19e   : > { %v249_v36 = vmul.f32 %v669_v21, %v248_v34  ;;  %v250_v37 = vmul.f32 %v671_v22, %v248_v34  ;;  %v272_v38 = vsub.f32 2.0, %v271_v35 }
 0x1a0   : > { %251 = vst [vmem:[#allocation2 + $0x10] sm:$0xff] %v249_v36  ;;  %252 = vst [vmem:[#allocation2] sm:$0xff] %v250_v37  ;;  %v273_v39 = vmul.f32 %v679_v33, %v272_v38 }
 0x1a2   : > { %v274_v40 = vmul.f32 %v673_v24, %v273_v39  ;;  %v275_v41 = vmul.f32 %v675_v25, %v273_v39 }
 0x1a4   : > { %277 = vst [vmem:[#allocation2 + $0x18] sm:$0xff] %v274_v40  ;;  %278 = vst [vmem:[#allocation2 + $0x8] sm:$0xff] %v275_v41 }
 0x1a5 PF: > { %v279_v42 = vld [vmem:[%s186_s11] sm:$0xff]  ;;  %v280_v43 = vld [vmem:[%s186_s11 + $0x8] sm:$0xff]  ;;  %v281_v44 = vstv %s1107_s9  ;;  %p545_p0 = scmp.eq.s32.totalorder %s876_s20, 0 }
 0x1a6   : > { %v282_v45 = vmul.f32 %v281_v44, %v279_v42  ;;  %v283_v46 = vmul.f32 %v281_v44, %v280_v43 }
 0x1a8   : > { %v284_v47 = vmax.f32 %v282_v45, %v283_v46 }
 0x1aa   : > { %285 = vmax.xlane.f32.xlu0 %v284_v47 }
 0x233   : > { %v286_v48 = vpop.xlane.xlu0 %285 }
 0x234   : > { %v287_v49 = vsub.f32 %v282_v45, %v286_v48  ;;  %v288_v50 = vsub.f32 %v283_v46, %v286_v48 }
 0x236   : > { %v289_v51 = vmul.f32 1.442695, %v287_v49  ;;  %v291_v52 = vmul.f32 1.442695, %v288_v50 }
 0x238   : > { %680 = vpow2.f32 %v289_v51 }
 0x239   : > { %682 = vpow2.f32 %v291_v52 }
 0x245   : > { %v681_v53 = vpop.eup %680 }
 0x246   : > { %v683_v54 = vpop.eup %682 }
 0x247   : > { %v293_v55 = vadd.f32 %v683_v54, %v681_v53 }
 0x249   : > { %294 = vadd.xlane.f32.xlu0 %v293_v55 }
 0x2d2   : > { %v295_v56 = vpop.xlane.xlu0 %294 }
 0x2d3   : > { %684 = vrcp.f32 %v295_v56 }
 0x2e0   : > { %v685_v57 = vpop.eup %684 }
 0x2e1   : > { %v297_v58 = vmul.f32 %v685_v57, %v295_v56 }
 0x2e3   : > { %v298_v59 = vsub.f32 2.0, %v297_v58 }
 0x2e5   : > { %v299_v60 = vmul.f32 %v685_v57, %v298_v59 }
 0x2e7   : > { %v300_v61 = vmul.f32 %v681_v53, %v299_v60  ;;  %v301_v62 = vmul.f32 %v683_v54, %v299_v60 }
 0x2e9   : > { %686 = vrcp.f32 %v300_v61  ;;  %v310_v63 = vsub.f32 1.0, %v300_v61  ;;  %v311_v0 = vsub.f32 1.0, %v301_v62 }
 0x2ea   : > { %688 = vrcp.f32 %v301_v62 }
 0x2eb   : > { %690 = vrcp.f32 %v310_v63 }
 0x2ec   : > { %692 = vrcp.f32 %v311_v0 }
 0x2f6   : > { %v687_v1 = vpop.eup %686 }
 0x2f7   : > { %v689_v2 = vpop.eup %688  ;;  %v304_v3 = vmul.f32 %v687_v1, %v300_v61 }
 0x2f8   : > { %v691_v4 = vpop.eup %690  ;;  %v305_v5 = vmul.f32 %v689_v2, %v301_v62 }
 0x2f9   : > { %v693_v6 = vpop.eup %692  ;;  %v306_v7 = vsub.f32 2.0, %v304_v3  ;;  %v314_v8 = vmul.f32 %v691_v4, %v310_v63 }
 0x2fa   : > { %v307_v9 = vsub.f32 2.0, %v305_v5  ;;  %v315_v10 = vmul.f32 %v693_v6, %v311_v0  ;;  %323 = sbr.rel (%p545_p0) target bundleno = 1139 (0x473), region = 44 }
 0x2fb   : > { %v308_v11 = vmul.f32 %v687_v1, %v306_v7  ;;  %v316_v12 = vsub.f32 2.0, %v314_v8 }
 0x2fc   : > { %v309_v13 = vmul.f32 %v689_v2, %v307_v9  ;;  %v317_v14 = vsub.f32 2.0, %v315_v10 }
 0x2fd   : > { %v318_v15 = vmul.f32 %v691_v4, %v316_v12 }
 0x2fe   : > { %v319_v16 = vmul.f32 %v693_v6, %v317_v14 }
 0x2ff   : > { %v324_v17 = vld [vmem:[#allocation2 + $0x10] sm:$0xff]  ;;  %v325_v18 = vld [vmem:[#allocation2] sm:$0xff]  ;;  %vm347_vm0 = vcmask 7168  }
 0x300   : > { %v326_v19 = vmul.f32 %v324_v17, %v324_v17  ;;  %v327_v20 = vmul.f32 %v325_v18, %v325_v18  ;;  %v333_v21 = vsub.f32 1.0, %v324_v17  ;;  %v334_v22 = vsub.f32 1.0, %v325_v18  ;;  %v358_v46 = vld [vmem:[%s1109_s30] sm:$0xff] }
 0x302   : > { %v328_v23 = vmul.f32 %v326_v19, %v308_v11  ;;  %v329_v24 = vmul.f32 %v327_v20, %v309_v13  ;;  %v335_v25 = vmul.f32 %v333_v21, %v333_v21  ;;  %v336_v26 = vmul.f32 %v334_v22, %v334_v22 }
 0x304   : > { %v330_v27 = vadd.f32 %v329_v24, %v328_v23  ;;  %v337_v28 = vmul.f32 %v335_v25, %v318_v15  ;;  %v338_v29 = vmul.f32 %v336_v26, %v319_v16 }
 0x306   : > { %331 = vadd.xlane.f32.xlu0 %v330_v27  ;;  %v339_v30 = vadd.f32 %v338_v29, %v337_v28 }
 0x30a   : > { %340 = vadd.xlane.f32.xlu0 %v339_v30 }
 0x38f   : > { %v332_v31 = vpop.xlane.xlu0 %331 }
 0x390   : > { %694 = vlog2.f32 %v332_v31 }
 0x393   : > { %v341_v32 = vpop.xlane.xlu0 %340 }
 0x394   : > { %696 = vlog2.f32 %v341_v32 }
 0x39d   : > { %v695_v33 = vpop.eup %694 }
 0x39e   : > { %v343_v36 = vmul.f32 0.6931472, %v695_v33 }
 0x3a1   : > { %v697_v34 = vpop.eup %696 }
 0x3a2   : > { %v345_v35 = vmul.f32 0.6931472, %v697_v34 }
 0x3a4   : > { %v346_v37 = vadd.f32 %v345_v35, %v343_v36 }
 0x3a6   : > { %v348_v38 = vsel %vm347_vm0, %v346_v37, 0.0 }
 0x3a7   : > { %349 = vadd.xlane.f32.xlu1 %v348_v38 }
 0x430   : > { %v350_v39 = vpop.xlane.xlu1 %349 }
 0x431   : > { %v351_v40 = vrot.slane %v350_v39, 4 }
 0x433   : > { %v352_v41 = vadd.f32 %v351_v40, %v350_v39 }
 0x435   : > { %v353_v42 = vrot.slane %v352_v41, 2 }
 0x437   : > { %v354_v43 = vadd.f32 %v353_v42, %v352_v41 }
 0x439   : > { %v355_v44 = vrot.slane %v354_v43, 1 }
 0x43b   : > { %v356_v45 = vadd.f32 %v355_v44, %v354_v43 }
 0x43d   : > { %552 = vpush %v356_v45 }
 0x46e   : > { %s553_s13 = spop %552 }
 0x46f   : > { %v359_v47 = vstv %s553_s13 }
 0x470   : > { %v360_v48 = vadd.f32 %v359_v47, %v358_v46 }
 0x472   : > { %361 = vst [vmem:[%s1109_s30] sm:$0xff] %v360_v48 }
 0x473 PF: > { %p546_p1 = scmp.eq.s32.totalorder %s876_s20, 1 }
 0x475   : > { %365 = sbr.rel (%p546_p1) target bundleno = 1518 (0x5ee), region = 48 }
 0x47a   : > { %v367_v49 = vld [vmem:[#allocation2 + $0x18] sm:$0xff]  ;;  %v368_v50 = vld [vmem:[#allocation2 + $0x8] sm:$0xff]  ;;  %vm390_vm1 = vcmask 7168  }
 0x47b   : > { %v369_v51 = vmul.f32 %v367_v49, %v367_v49  ;;  %v370_v52 = vmul.f32 %v368_v50, %v368_v50  ;;  %v376_v53 = vsub.f32 1.0, %v367_v49  ;;  %v377_v54 = vsub.f32 1.0, %v368_v50  ;;  %v401_v14 = vld [vmem:[%s1109_s30] sm:$0xff] }
 0x47d   : > { %v371_v55 = vmul.f32 %v369_v51, %v308_v11  ;;  %v372_v56 = vmul.f32 %v370_v52, %v309_v13  ;;  %v378_v57 = vmul.f32 %v376_v53, %v376_v53  ;;  %v379_v58 = vmul.f32 %v377_v54, %v377_v54 }
 0x47f   : > { %v373_v59 = vadd.f32 %v372_v56, %v371_v55  ;;  %v380_v60 = vmul.f32 %v378_v57, %v318_v15  ;;  %v381_v61 = vmul.f32 %v379_v58, %v319_v16 }
 0x481   : > { %374 = vadd.xlane.f32.xlu0 %v373_v59  ;;  %v382_v62 = vadd.f32 %v381_v61, %v380_v60 }
 0x485   : > { %383 = vadd.xlane.f32.xlu0 %v382_v62 }
 0x50a   : > { %v375_v63 = vpop.xlane.xlu0 %374 }
 0x50b   : > { %698 = vlog2.f32 %v375_v63 }
 0x50e   : > { %v384_v0 = vpop.xlane.xlu0 %383 }
 0x50f   : > { %700 = vlog2.f32 %v384_v0 }
 0x518   : > { %v699_v1 = vpop.eup %698 }
 0x519   : > { %v386_v4 = vmul.f32 0.6931472, %v699_v1 }
 0x51c   : > { %v701_v2 = vpop.eup %700 }
 0x51d   : > { %v388_v3 = vmul.f32 0.6931472, %v701_v2 }
 0x51f   : > { %v389_v5 = vadd.f32 %v388_v3, %v386_v4 }
 0x521   : > { %v391_v6 = vsel %vm390_vm1, %v389_v5, 0.0 }
 0x522   : > { %392 = vadd.xlane.f32.xlu1 %v391_v6 }
 0x5ab   : > { %v393_v7 = vpop.xlane.xlu1 %392 }
 0x5ac   : > { %v394_v8 = vrot.slane %v393_v7, 4 }
 0x5ae   : > { %v395_v9 = vadd.f32 %v394_v8, %v393_v7 }
 0x5b0   : > { %v396_v10 = vrot.slane %v395_v9, 2 }
 0x5b2   : > { %v397_v11 = vadd.f32 %v396_v10, %v395_v9 }
 0x5b4   : > { %v398_v12 = vrot.slane %v397_v11, 1 }
 0x5b6   : > { %v399_v13 = vadd.f32 %v398_v12, %v397_v11 }
 0x5b8   : > { %554 = vpush %v399_v13 }
 0x5e9   : > { %s555_s20 = spop %554 }
 0x5ea   : > { %v402_v15 = vstv %s555_s20 }
 0x5eb   : > { %v403_v16 = vadd.f32 %v402_v15, %v401_v14 }
 0x5ed   : > { %404 = vst [vmem:[%s1109_s30] sm:$0xff] %v403_v16 }
 0x5ee PF: > { %s548_s27 = sshll.u32 %s880_s21, 7  ;;  %s419_s28 = sshll.u32 %s1109_s30, 4  ;;  %s420_s28 = int_to_ptr.vmem [resolvable:$true] %s419_s28 }
 0x5ef   : > { %s417_s8 = scalar_lea.hbm %s1182_s3, %s548_s27  ;;  %s406_s25 = scalar_lea.sflag [#allocation7], %s1098_s22 }
 0x5f0   : > { %s766_s26 = scalar_lea.vmem %s420_s28, 128  ;;  %p1204_p4 = scmp.ne.s32.totalorder %s1198_s14, 0 }
 0x5f1   : > { %p767_p12 = scmp.ne.s32.totalorder %s420_s28, %s766_s26  ;;  %s901_s11 = smov [#allocation10]  }
 0x5f2   : > { %s770_s12 = sshll.u32 %s901_s11, 4  ;;  %s771_s12 = int_to_ptr.vmem [resolvable:$false] %s770_s12 }
 0x5f3   : > { %p768_p13 = pnand %p767_p12, %p1204_p4  ;;  %s772_s4 = scalar_lea.vmem %s771_s12, 256 }
 0x5f4   : > { %p773_p5 = scmp.lt.s32.totalorder %s420_s28, %s771_s12  ;;  %p774_p6 = scmp.lt.s32.totalorder %s772_s4, %s766_s26 }
 0x5f5   : > { %p769_p2 = pneg %p768_p13 }
 0x5f6   : > { %p775_p9 = por %p774_p6, %p773_p5 }
 0x5f8   : > { %p776_p10 = pnand %p775_p9, %p769_p2 }
 0x5fa   : > { %779 = shalt.err (!%p776_p10)
}
 0x5fb   : > { %s780_s21 = scalar_lea.hbm %s417_s8, 128  ;;  %s784_s6 = scalar_lea.hbm %s1182_s3, 256 }
 0x5fc   : > { %p781_p3 = scmp.ne.s32.totalorder %s417_s8, %s780_s21  ;;  %p785_p7 = scmp.lt.s32.totalorder %s417_s8, %s1182_s3 }
 0x5fd   : > { %p786_p0 = scmp.lt.s32.totalorder %s784_s6, %s780_s21 }
 0x5fe   : > { %p782_p11 = pnand %p781_p3, %p1204_p4 }
 0x5ff   : > { %p787_p1 = por %p786_p0, %p785_p7 }
 0x600   : > { %p783_p8 = pneg %p782_p11 }
 0x602   : > { %p788_p12 = pnand %p787_p1, %p783_p8 }
 0x604   : > { %791 = shalt.err (!%p788_p12)
}
 0x605   : > { %560 = dma.vmem_to_hbm [thread:$0]  (%p1204_p4), %s420_s28, 128, %s417_s8, %s406_s25  }
 0x606 PF: > { %p574_p13 = scmp.ge.s32.totalorder %s892_s24, 2  ;;  %s431_s30 = sand.u32 1, %s852_s15  }
 0x607   : > { %p1205_p2 = scmp.ne.s32.totalorder %s1199_s18, 0  ;;  %s432_s13 = scalar_lea.sflag [#allocation7], %s431_s30 }
 0x609   : > { %p570_p5 = pnand %p574_p13, %p1205_p2 }
 0x60b   : > { %p571_p6 = pneg %p570_p5 }
 0x60d   : > { %847 = dma.done.wait (%p571_p6), %s432_s13, 128  }
 0x60e   : > { %849 = vsyncadd (%p571_p6), %s432_s13, 4294967168  ;;  %s26_s24 = sadd.s32 1, %s892_s24   ;;  %s1206_s20 = sld [smem:[#allocation18_spill]] }
 0x60f   : > { %p23_p9 = scmp.ge.s32.totalorder %s26_s24, 8   ;;  %s1207_s14 = sld [smem:[#allocation19_spill]] }
 0x610   : > { %s1208_s27 = sld [smem:[#allocation15_spill]]  ;;  %s1211_s15 = smov %s856_s16 }
 0x611   : > { %s1209_s22 = sld [smem:[#allocation16_spill]]  ;;  %s1212_s16 = smov %s860_s17 }
 0x612   : > { %s1210_s10 = sld [smem:[#allocation17_spill]]  ;;  %s1214_s18 = smov %s868_s19 }
 0x613   : > { %s1215_s19 = smov %s872_s0  ;;  %s1218_s21 = smov %s888_s23 }
 0x614   : > { %s1213_s17 = smov %s1206_s20  ;;  %25 = sbr.rel (!%p23_p9) target bundleno = 16 (0x10), region = 101 }
 0x615   : > { %s1216_s0 = smov %s1207_s14 }
 0x616   : > { %s1217_s20 = smov %s1208_s27 }
 0x618   : > { %s1219_s23 = smov %s1210_s10 }
 0x619   :  { %437 = vsyncpa [#allocation6], 1 }
 0x61a   :  { %439 = vsyncpa [#allocation6 + $0x1], 1 }
 0x61b   :  { %440 = vsyncpa [#allocation9], 1 }
 0x61c   :  { %442 = vsyncpa [#allocation9 + $0x1], 1 }
 0x61d   :  { %443 = vsyncpa [#allocation7], 1 }
 0x61e   :  { %445 = vsyncpa [#allocation7 + $0x1], 1 }

</bundles_post_ra>
